<compile_context>
chip_gen: v7x
topology: tpu7x:2x2x1
jax: 0.10.0
libtpu: 0.0.40
codegen_flags: <defaults>
</compile_context>

<pallas_src>
import functools

import jax
import jax.numpy as jnp
from jax.experimental import pallas as pl
from jax.experimental.pallas import tpu as pltpu

NEG_SLOPE = 0.1   # nn.LeakyReLU(negative_slope=0.1)
LANE = 128        # vreg lane width
SUBLANE = 8       # f32 sublane count


def _leaky_relu(x):
    return jnp.where(x >= 0, x, NEG_SLOPE * x)


def _round_up(n, m):
    return (n + m - 1) // m * m


def _mlp_kernel(n_layers, x_ref, w_ref, b_ref, out_ref):
    """Fused padded MLP forward; everything VMEM-resident, single invocation.

    x_ref:   (B_pad, D)      padded activations
    w_ref:   (L, D, D)       zero-padded weights, layer i in w_ref[i]
    b_ref:   (L, D)          zero-padded biases
    out_ref: (B_pad, D)      lane-dense padded output
    """
    h = x_ref[...]
    for i in range(n_layers):
        h = jnp.dot(h, w_ref[i], preferred_element_type=jnp.float32)
        h = h + b_ref[i:i + 1, :]          # (1, D) broadcasts over batch rows
        if i < n_layers - 1:               # final passage has no activation
            h = _leaky_relu(h)
    out_ref[...] = h.astype(out_ref.dtype)


def mlp_forward(x, weights, biases):
    """Run the fused MLP Pallas kernel.

    x:       (B, arch[0]) float32
    weights: list of (arch[i], arch[i+1]) float32 (already transposed to in x out)
    biases:  list of (arch[i+1],) float32
    Returns: (B, arch[-1]) float32
    """
    n_layers = len(weights)
    batch, in_dim = x.shape
    out_dim = weights[-1].shape[1]

    # Common padded width: every layer dim rounded up to a lane multiple.
    dims = [in_dim] + [w.shape[1] for w in weights]
    d_pad = max(_round_up(d, LANE) for d in dims)
    b_pad = _round_up(batch, SUBLANE)

    # Zero-pad activations and pack all weights / biases into single slabs.
    x_p = jnp.zeros((b_pad, d_pad), jnp.float32).at[:batch, :in_dim].set(x)
    w_p = jnp.zeros((n_layers, d_pad, d_pad), jnp.float32)
    b_p = jnp.zeros((n_layers, d_pad), jnp.float32)
    for i, (w, b) in enumerate(zip(weights, biases)):
        w_p = w_p.at[i, : w.shape[0], : w.shape[1]].set(w)
        b_p = b_p.at[i, : b.shape[0]].set(b)

    vmem_spec = pl.BlockSpec(memory_space=pltpu.MemorySpace.VMEM)

    out_p = pl.pallas_call(
        functools.partial(_mlp_kernel, n_layers),
        in_specs=[vmem_spec, vmem_spec, vmem_spec],
        out_specs=vmem_spec,
        out_shape=jax.ShapeDtypeStruct((b_pad, d_pad), jnp.float32),
    )(x_p, w_p, b_p)

    # Slice the padded lane-dense slab back to the real output.
    return out_p[:batch, :out_dim]


def init_params(arch, key):
    """Deterministic init mimicking nn.Linear default U[-1/sqrt(in), 1/sqrt(in)].

    Returns weights already transposed to (in, out).
    """
    weights, biases = [], []
    for i in range(len(arch) - 1):
        fan_in, fan_out = arch[i], arch[i + 1]
        key, kw, kb = jax.random.split(key, 3)
        bound = 1.0 / jnp.sqrt(jnp.float32(fan_in))
        w = jax.random.uniform(kw, (fan_in, fan_out), jnp.float32, -bound, bound)
        b = jax.random.uniform(kb, (fan_out,), jnp.float32, -bound, bound)
        weights.append(w)
        biases.append(b)
    return weights, biases


def mlp_reference(x, weights, biases):
    h = x
    n = len(weights)
    for i in range(n):
        h = h @ weights[i] + biases[i]
        if i < n - 1:
            h = _leaky_relu(h)
    return h


if __name__ == "__main__":
    # Architecture must have length >= 3 (input, >=1 hidden, output).
    arch = [16, 32, 32, 8]
    batch = 4

    key = jax.random.PRNGKey(0)
    key, kx = jax.random.split(key)
    x = jax.random.normal(kx, (batch, arch[0]), dtype=jnp.float32)

    weights, biases = init_params(arch, key)

    out = jax.block_until_ready(mlp_forward(x, weights, biases))

    ref = mlp_reference(x, weights, biases)
    assert out.shape == (batch, arch[-1])
    assert jnp.allclose(out, ref, atol=1e-5, rtol=1e-5), "mismatch vs reference"

    print("KERNEL_OK")
</pallas_src>

<mosaic_0001>
module attributes {stable_mosaic.version = 11 : i64} {
  func.func @_mlp_kernel(%arg0: memref<8x128xf32, #tpu.memory_space<vmem>>, %arg1: memref<3x128x128xf32, #tpu.memory_space<vmem>>, %arg2: memref<3x128xf32, #tpu.memory_space<vmem>>, %arg3: memref<8x128xf32, #tpu.memory_space<vmem>>) attributes {dimension_semantics = [], scalar_prefetch = 0 : i64, scratch_operands = 0 : i64, tpu.core_type = #tpu.core_type<tc>} {
    %c0 = arith.constant 0 : index
    %c0_0 = arith.constant 0 : index
    %0 = vector.load %arg0[%c0, %c0_0] : memref<8x128xf32, #tpu.memory_space<vmem>>, vector<8x128xf32>
    %c0_1 = arith.constant 0 : index
    %c0_2 = arith.constant 0 : index
    %c0_3 = arith.constant 0 : index
    %1 = vector.load %arg1[%c0_1, %c0_2, %c0_3] : memref<3x128x128xf32, #tpu.memory_space<vmem>>, vector<1x128x128xf32>
    %2 = vector.shape_cast %1 : vector<1x128x128xf32> to vector<128x128xf32>
    %cst = arith.constant dense<0.000000e+00> : vector<8x128xf32>
    %3 = tpu.matmul %0, %2, %cst {dimension_numbers = #tpu.dot_dimension_numbers<[1], [0], [0], [1], [0, 0, 1, 1], [], []>} : vector<8x128xf32>, vector<128x128xf32>, vector<8x128xf32> -> vector<8x128xf32>
    %c0_4 = arith.constant 0 : index
    %c0_5 = arith.constant 0 : index
    %4 = vector.load %arg2[%c0_4, %c0_5] : memref<3x128xf32, #tpu.memory_space<vmem>>, vector<1x128xf32>
    %5 = vector.broadcast %4 : vector<1x128xf32> to vector<8x128xf32>
    %6 = arith.addf %3, %5 : vector<8x128xf32>
    %cst_6 = arith.constant 0.000000e+00 : f32
    %7 = vector.broadcast %cst_6 : f32 to vector<8x128xf32>
    %8 = arith.cmpf oge, %6, %7 : vector<8x128xf32>
    %cst_7 = arith.constant 1.000000e-01 : f32
    %9 = vector.broadcast %cst_7 : f32 to vector<8x128xf32>
    %10 = arith.mulf %9, %6 : vector<8x128xf32>
    %11 = arith.select %8, %6, %10 : vector<8x128xi1>, vector<8x128xf32>
    %c1 = arith.constant 1 : index
    %c0_8 = arith.constant 0 : index
    %c0_9 = arith.constant 0 : index
    %12 = vector.load %arg1[%c1, %c0_8, %c0_9] : memref<3x128x128xf32, #tpu.memory_space<vmem>>, vector<1x128x128xf32>
    %13 = vector.shape_cast %12 : vector<1x128x128xf32> to vector<128x128xf32>
    %cst_10 = arith.constant dense<0.000000e+00> : vector<8x128xf32>
    %14 = tpu.matmul %11, %13, %cst_10 {dimension_numbers = #tpu.dot_dimension_numbers<[1], [0], [0], [1], [0, 0, 1, 1], [], []>} : vector<8x128xf32>, vector<128x128xf32>, vector<8x128xf32> -> vector<8x128xf32>
    %c1_11 = arith.constant 1 : index
    %c0_12 = arith.constant 0 : index
    %15 = vector.load %arg2[%c1_11, %c0_12] : memref<3x128xf32, #tpu.memory_space<vmem>>, vector<1x128xf32>
    %16 = vector.broadcast %15 : vector<1x128xf32> to vector<8x128xf32>
    %17 = arith.addf %14, %16 : vector<8x128xf32>
    %cst_13 = arith.constant 0.000000e+00 : f32
    %18 = vector.broadcast %cst_13 : f32 to vector<8x128xf32>
    %19 = arith.cmpf oge, %17, %18 : vector<8x128xf32>
    %cst_14 = arith.constant 1.000000e-01 : f32
    %20 = vector.broadcast %cst_14 : f32 to vector<8x128xf32>
    %21 = arith.mulf %20, %17 : vector<8x128xf32>
    %22 = arith.select %19, %17, %21 : vector<8x128xi1>, vector<8x128xf32>
    %c2 = arith.constant 2 : index
    %c0_15 = arith.constant 0 : index
    %c0_16 = arith.constant 0 : index
    %23 = vector.load %arg1[%c2, %c0_15, %c0_16] : memref<3x128x128xf32, #tpu.memory_space<vmem>>, vector<1x128x128xf32>
    %24 = vector.shape_cast %23 : vector<1x128x128xf32> to vector<128x128xf32>
    %cst_17 = arith.constant dense<0.000000e+00> : vector<8x128xf32>
    %25 = tpu.matmul %22, %24, %cst_17 {dimension_numbers = #tpu.dot_dimension_numbers<[1], [0], [0], [1], [0, 0, 1, 1], [], []>} : vector<8x128xf32>, vector<128x128xf32>, vector<8x128xf32> -> vector<8x128xf32>
    %c2_18 = arith.constant 2 : index
    %c0_19 = arith.constant 0 : index
    %26 = vector.load %arg2[%c2_18, %c0_19] : memref<3x128xf32, #tpu.memory_space<vmem>>, vector<1x128xf32>
    %27 = vector.broadcast %26 : vector<1x128xf32> to vector<8x128xf32>
    %28 = arith.addf %25, %27 : vector<8x128xf32>
    %c0_20 = arith.constant 0 : index
    %c0_21 = arith.constant 0 : index
    %29 = vector.load %arg3[%c0_20, %c0_21] : memref<8x128xf32, #tpu.memory_space<vmem>>, vector<8x128xf32>
    tpu.vector_store %arg3[%c0_20, %c0_21], %28 {strides = array<i32>} : memref<8x128xf32, #tpu.memory_space<vmem>>, vector<8x128xf32>,
    return
  }
}

</mosaic_0001>

<bundles_post_ra>
// kernel: tpu_custom_call.1
= control target key start
LH: loop header
LB: loop body
LE: loop exit
PB: predicated region body
PF: predicated region fallthrough
CT: control target
= control target key end

     0   :  { %8 = vsyncpa [#allocation3], 0  ;;  %s761_s0 = inlined_call_operand.hbm [shape: f32[8,128], index: 0, kind: input, shape index: {}]   ;;  %s762_s1 = inlined_call_operand.hbm [shape: f32[3,128,128], index: 1, kind: input, shape index: {}]   ;;  %s763_s2 = inlined_call_operand.vmem [shape: f32[3,128], index: 2, kind: input, shape index: {}]   ;;  %s764_s3 = inlined_call_operand.hbm [shape: f32[8,128], index: 3, kind: output, shape index: {}]  }
   0x1   :  { %9 = vsyncpa [#allocation6], 0 }
   0x2   :  { %10 = vsyncpa [#allocation4], 0  ;;  %s651_s12 = smov [#allocation2]   ;;  %s652_s14 = smov [#allocation5]  }
   0x3   :  { %s17_s13 = sshll.u32 %s651_s12, 4  ;;  %s26_s15 = sshll.u32 %s652_s14, 4  ;;  %s18_s13 = int_to_ptr.vmem [resolvable:$true] %s17_s13  ;;  %s679_s15 = int_to_ptr.vmem [resolvable:$true] %s26_s15 }
   0x4   :  { %s579_s18 = scalar_lea.hbm %s761_s0, 128 }
   0x5   :  { %p580_p0 = scmp.ne.s32.totalorder %s761_s0, %s579_s18  ;;  %p583_p1 = scmp.lt.u32.totalorder %s579_s18, %s761_s0 }
   0x7   :  { %p585_p2 = pnand %p583_p1, %p580_p0 }
   0x9   :  { %588 = shalt.err (!%p585_p2)
}
   0xa   :  { %s589_s23 = scalar_lea.vmem %s18_s13, 128  ;;  %p594_p4 = scmp.lt.s32.totalorder %s18_s13, %s18_s13 }
   0xb   :  { %p590_p3 = scmp.ne.s32.totalorder %s18_s13, %s589_s23  ;;  %p595_p5 = scmp.lt.s32.totalorder %s589_s23, %s589_s23 }
   0xd   :  { %p596_p6 = por %p595_p5, %p594_p4 }
   0xf   :  { %p597_p7 = pnand %p596_p6, %p590_p3 }
  0x11   :  { %600 = shalt.err (!%p597_p7)
}
  0x12   :  { %20 = dma.hbm_to_vmem [thread:$0]  %s761_s0, 128, %s18_s13, [#allocation3]  }
  0x13   :  { %s601_s28 = scalar_lea.hbm %s762_s1, 6144 }
  0x14   :  { %p602_p8 = scmp.ne.s32.totalorder %s762_s1, %s601_s28  ;;  %p605_p9 = scmp.lt.u32.totalorder %s601_s28, %s762_s1 }
  0x16   :  { %p607_p10 = pnand %p605_p9, %p602_p8 }
  0x18   :  { %610 = shalt.err (!%p607_p10)
}
  0x19   :  { %s611_s6 = scalar_lea.vmem %s679_s15, 6144  ;;  %p616_p12 = scmp.lt.s32.totalorder %s679_s15, %s679_s15 }
  0x1a   :  { %p612_p11 = scmp.ne.s32.totalorder %s679_s15, %s611_s6  ;;  %p617_p13 = scmp.lt.s32.totalorder %s611_s6, %s611_s6 }
  0x1c   :  { %p618_p0 = por %p617_p13, %p616_p12 }
  0x1e   :  { %p619_p1 = pnand %p618_p0, %p612_p11 }
  0x20   :  { %622 = shalt.err (!%p619_p1)
}
  0x21   :  { %s653_s0 = smov 128   ;;  %s654_s7 = smov 8  }
  0x22   :  { %32 = dma.hbm_to_vmem [thread:$0]  %s762_s1, 6144, %s679_s15, [#allocation6], %s653_s0, %s653_s0, %s654_s7  }
  0x23   :  { %645 = dma.done.wait [#allocation3], 128  }
  0x24   :  { %646 = vsyncadd [#allocation3], 4294967168 }
  0x25   :  { %647 = dma.done.wait [#allocation6], 6144  }
  0x26   :  { %648 = vsyncadd [#allocation6], 4294961152  ;;  %v655_v0 = vmov 0.0|0.0   ;;  %vm656_vm0 = vmmov 0   ;;  %v657_v1 = vmov 0.0   ;;  %v42_v2 = vld [vmem:[#allocation5] sm:$0xff] }
  0x27   :  { %499 = vmatprep.subr.bf16.mxu0 %v655_v0  ;;  %426 = vmatprep.mubr.msk.f32.mxu0 %vm656_vm0, %v657_v1  ;;  %v43_v3 = vld [vmem:[#allocation5 + $0x8] sm:$0xff]  ;;  %v44_v4 = vld [vmem:[#allocation5 + $0x10] sm:$0xff]  ;;  %v45_v6 = vld [vmem:[#allocation5 + $0x18] sm:$0xff]  ;;  %s658_s15 = smov [#allocation7]  }
  0x28   :  { %523 = vmatprep.subr.bf16.mxu1 %v655_v0  ;;  %461 = vmatprep.mubr.msk.f32.mxu1 %vm656_vm0, %v657_v1  ;;  %v500_v5 = vpack.c.bf16 %v43_v3, %v42_v2  ;;  %v503_v7 = vpack.c.bf16 %v45_v6, %v44_v4  ;;  %v46_v8 = vld [vmem:[#allocation5 + $0x20] sm:$0xff]  ;;  %v47_v9 = vld [vmem:[#allocation5 + $0x28] sm:$0xff]  ;;  %v139_v12 = vld [vmem:[#allocation5 + $0x90] sm:$0xff]  ;;  %s330_s16 = sshll.u32 %s658_s15, 4  ;;  %s331_s16 = int_to_ptr.vmem [resolvable:$true] %s330_s16 }
  0x29   :  { %v137_v10 = vld [vmem:[#allocation5 + $0x80] sm:$0xff]  ;;  %v138_v11 = vld [vmem:[#allocation5 + $0x88] sm:$0xff]  ;;  %v140_v13 = vld [vmem:[#allocation5 + $0x98] sm:$0xff]  ;;  %v506_v14 = vpack.c.bf16 %v47_v9, %v46_v8  ;;  %s623_s17 = scalar_lea.vmem %s331_s16, 128  ;;  %p628_p3 = scmp.lt.s32.totalorder %s331_s16, %s331_s16 }
  0x2a   :  { %501 = vmatpush3.bf16.msra.mxu0 %v500_v5  ;;  %v524_v15 = vpack.c.bf16 %v138_v11, %v137_v10  ;;  %v48_v16 = vld [vmem:[#allocation5 + $0x30] sm:$0xff]  ;;  %v49_v17 = vld [vmem:[#allocation5 + $0x38] sm:$0xff]  ;;  %v527_v18 = vpack.c.bf16 %v140_v13, %v139_v12  ;;  %v141_v19 = vld [vmem:[#allocation5 + $0xa0] sm:$0xff]  ;;  %p624_p2 = scmp.ne.s32.totalorder %s331_s16, %s623_s17  ;;  %p629_p4 = scmp.lt.s32.totalorder %s623_s17, %s623_s17 }
  0x2b   :  { %502 = vmatprep.subr.bf16.mxu0 %v655_v0  ;;  %v142_v20 = vld [vmem:[#allocation5 + $0xa8] sm:$0xff]  ;;  %v509_v21 = vpack.c.bf16 %v49_v17, %v48_v16  ;;  %v50_v22 = vld [vmem:[#allocation5 + $0x40] sm:$0xff]  ;;  %v143_v25 = vld [vmem:[#allocation5 + $0xb0] sm:$0xff] }
  0x2c   :  { %525 = vmatpush3.bf16.msra.mxu1 %v524_v15  ;;  %v51_v23 = vld [vmem:[#allocation5 + $0x48] sm:$0xff]  ;;  %v530_v24 = vpack.c.bf16 %v142_v20, %v141_v19  ;;  %v144_v26 = vld [vmem:[#allocation5 + $0xb8] sm:$0xff]  ;;  %v52_v28 = vld [vmem:[#allocation5 + $0x50] sm:$0xff]  ;;  %p630_p5 = por %p629_p4, %p628_p3 }
  0x2d   :  { %526 = vmatprep.subr.bf16.mxu1 %v655_v0  ;;  %v512_v27 = vpack.c.bf16 %v51_v23, %v50_v22  ;;  %v53_v29 = vld [vmem:[#allocation5 + $0x58] sm:$0xff]  ;;  %v533_v30 = vpack.c.bf16 %v144_v26, %v143_v25  ;;  %v145_v31 = vld [vmem:[#allocation5 + $0xc0] sm:$0xff]  ;;  %v146_v32 = vld [vmem:[#allocation5 + $0xc8] sm:$0xff] }
  0x2e   :  { %504 = vmatpush3.bf16.msra.mxu0 %v503_v7  ;;  %v515_v33 = vpack.c.bf16 %v53_v29, %v52_v28  ;;  %v54_v34 = vld [vmem:[#allocation5 + $0x60] sm:$0xff]  ;;  %v55_v35 = vld [vmem:[#allocation5 + $0x68] sm:$0xff]  ;;  %v536_v36 = vpack.c.bf16 %v146_v32, %v145_v31  ;;  %v147_v37 = vld [vmem:[#allocation5 + $0xd0] sm:$0xff]  ;;  %p631_p6 = pnand %p630_p5, %p624_p2 }
  0x2f   :  { %505 = vmatprep.subr.bf16.mxu0 %v655_v0  ;;  %v148_v38 = vld [vmem:[#allocation5 + $0xd8] sm:$0xff]  ;;  %v518_v39 = vpack.c.bf16 %v55_v35, %v54_v34  ;;  %v56_v40 = vld [vmem:[#allocation5 + $0x70] sm:$0xff]  ;;  %v149_v43 = vld [vmem:[#allocation5 + $0xe0] sm:$0xff] }
  0x30   :  { %528 = vmatpush3.bf16.msra.mxu1 %v527_v18  ;;  %v57_v41 = vld [vmem:[#allocation5 + $0x78] sm:$0xff]  ;;  %v539_v42 = vpack.c.bf16 %v148_v38, %v147_v37  ;;  %v150_v44 = vld [vmem:[#allocation5 + $0xe8] sm:$0xff]  ;;  %v151_v48 = vld [vmem:[#allocation5 + $0xf0] sm:$0xff] }
  0x31   :  { %529 = vmatprep.subr.bf16.mxu1 %v655_v0  ;;  %v521_v45 = vpack.c.bf16 %v57_v41, %v56_v40  ;;  %v542_v46 = vpack.c.bf16 %v150_v44, %v149_v43  ;;  %v41_v47 = vld [vmem:[#allocation2] sm:$0xff]  ;;  %v232_v51 = vld [vmem:[#allocation5 + $0x100] sm:$0xff]  ;;  %v233_v52 = vld [vmem:[#allocation5 + $0x108] sm:$0xff] }
  0x32   :  { %507 = vmatpush3.bf16.msra.mxu0 %v506_v14  ;;  %v152_v49 = vld [vmem:[#allocation5 + $0xf8] sm:$0xff]  ;;  %v234_v53 = vld [vmem:[#allocation5 + $0x110] sm:$0xff]  ;;  %v548_v54 = vpack.c.bf16 %v233_v52, %v232_v51  ;;  %v236_v57 = vld [vmem:[#allocation5 + $0x120] sm:$0xff] }
  0x33   :  { %508 = vmatprep.subr.bf16.mxu0 %v655_v0  ;;  %v545_v50 = vpack.c.bf16 %v152_v49, %v151_v48  ;;  %v235_v55 = vld [vmem:[#allocation5 + $0x118] sm:$0xff]  ;;  %v237_v58 = vld [vmem:[#allocation5 + $0x128] sm:$0xff]  ;;  %v238_v60 = vld [vmem:[#allocation5 + $0x130] sm:$0xff] }
  0x34   :  { %531 = vmatpush3.bf16.msra.mxu1 %v530_v24  ;;  %v551_v56 = vpack.c.bf16 %v235_v55, %v234_v53  ;;  %v554_v59 = vpack.c.bf16 %v237_v58, %v236_v57  ;;  %v239_v61 = vld [vmem:[#allocation5 + $0x138] sm:$0xff]  ;;  %v240_v63 = vld [vmem:[#allocation5 + $0x140] sm:$0xff]  ;;  %v242_v3 = vld [vmem:[#allocation5 + $0x150] sm:$0xff] }
  0x35   :  { %532 = vmatprep.subr.bf16.mxu1 %v655_v0  ;;  %v557_v62 = vpack.c.bf16 %v239_v61, %v238_v60  ;;  %v243_v4 = vld [vmem:[#allocation5 + $0x158] sm:$0xff]  ;;  %v244_v6 = vld [vmem:[#allocation5 + $0x160] sm:$0xff]  ;;  %v245_v7 = vld [vmem:[#allocation5 + $0x168] sm:$0xff] }
  0x36   :  { %510 = vmatpush3.bf16.msra.mxu0 %v509_v21  ;;  %v563_v5 = vpack.c.bf16 %v243_v4, %v242_v3  ;;  %v566_v8 = vpack.c.bf16 %v245_v7, %v244_v6  ;;  %v340_v9 = vld [vmem:[%s763_s2] ss:$0 sm:$0xff]  ;;  %v246_v15 = vld [vmem:[#allocation5 + $0x170] sm:$0xff]  ;;  %v341_v18 = vld [vmem:[%s763_s2 + $0x1] ss:$0 sm:$0xff] }
  0x37   :  { %511 = vmatprep.subr.bf16.mxu0 %v655_v0  ;;  %v247_v16 = vld [vmem:[#allocation5 + $0x178] sm:$0xff] }
  0x38   :  { %534 = vmatpush3.bf16.msra.mxu1 %v533_v30  ;;  %v569_v17 = vpack.c.bf16 %v247_v16, %v246_v15  ;;  %v342_v23 = vld [vmem:[%s763_s2 + $0x2] ss:$0 sm:$0xff] }
  0x39   :  { %535 = vmatprep.subr.bf16.mxu1 %v655_v0 }
  0x3a   :  { %513 = vmatpush3.bf16.msra.mxu0 %v512_v27 }
  0x3b   :  { %514 = vmatprep.subr.bf16.mxu0 %v655_v0 }
  0x3c   :  { %537 = vmatpush3.bf16.msra.mxu1 %v536_v36 }
  0x3d   :  { %538 = vmatprep.subr.bf16.mxu1 %v655_v0 }
  0x3e   :  { %516 = vmatpush3.bf16.msra.mxu0 %v515_v33 }
  0x3f   :  { %517 = vmatprep.subr.bf16.mxu0 %v655_v0 }
  0x40   :  { %540 = vmatpush3.bf16.msra.mxu1 %v539_v42 }
  0x41   :  { %541 = vmatprep.subr.bf16.mxu1 %v655_v0 }
  0x42   :  { %519 = vmatpush3.bf16.msra.mxu0 %v518_v39 }
  0x43   :  { %520 = vmatprep.subr.bf16.mxu0 %v655_v0 }
  0x44   :  { %543 = vmatpush3.bf16.msra.mxu1 %v542_v46 }
  0x45   :  { %544 = vmatprep.subr.bf16.mxu1 %v655_v0 }
  0x46   :  { %522 = vmatpush3.bf16.msra.mxu0 %v521_v45 }
  0x47   :  { %547 = vmatprep.subr.bf16.mxu0 %v655_v0 }
  0x48   :  { %546 = vmatpush3.bf16.msra.mxu1 %v545_v50 }
  0x49   :  { %427 = vmatmul.mubr.f32.vlgmr.msra.gmra.mrb[0].mxu0 %v41_v47 }
  0x4a   :  { %496 = vmatprep.mubr.msk.f32.mxu0 %vm656_vm0, %v657_v1  ;;  %549 = vmatpush3.bf16.msra.mxu0 %v548_v54  ;;  %v241_v1 = vld [vmem:[#allocation5 + $0x148] sm:$0xff] }
  0x4b   :  { %550 = vmatprep.subr.bf16.mxu0 %v655_v0  ;;  %v560_v2 = vpack.c.bf16 %v241_v1, %v240_v63 }
  0x4e   :  { %552 = vmatpush3.bf16.msra.mxu0 %v551_v56 }
  0x4f   :  { %553 = vmatprep.subr.bf16.mxu0 %v655_v0 }
  0x52   :  { %555 = vmatpush3.bf16.msra.mxu0 %v554_v59 }
  0x53   :  { %556 = vmatprep.subr.bf16.mxu0 %v655_v0 }
  0x56   :  { %558 = vmatpush3.bf16.msra.mxu0 %v557_v62 }
  0x57   :  { %559 = vmatprep.subr.bf16.mxu0 %v655_v0 }
  0x5a   :  { %561 = vmatpush3.bf16.msra.mxu0 %v560_v2 }
  0x5b   :  { %562 = vmatprep.subr.bf16.mxu0 %v655_v0 }
  0x5e   :  { %564 = vmatpush3.bf16.msra.mxu0 %v563_v5 }
  0x5f   :  { %565 = vmatprep.subr.bf16.mxu0 %v655_v0 }
  0x62   :  { %567 = vmatpush3.bf16.msra.mxu0 %v566_v8 }
  0x63   :  { %568 = vmatprep.subr.bf16.mxu0 %v655_v0 }
  0x66   :  { %570 = vmatpush3.bf16.msra.mxu0 %v569_v17 }
 0x11c   :  { %v129_v10 = vpop.f32.mrb[0].mxu0 }
 0x11d   :  { %v130_v11 = vadd.f32 %v340_v9, %v129_v10  ;;  %v428_v12 = vpop.f32.mrb[1].mxu0 }
 0x11f   :  { %v134_v13 = vmul.f32 0.1, %v130_v11  ;;  %vm133_vm1 = vcmp.ge.f32.partialorder %v130_v11, 0.0 }
 0x121   :  { %v135_v14 = vsel %vm133_vm1, %v130_v11, %v134_v13 }
 0x122   :  { %462 = vmatmul.mubr.f32.vlgmr.msra.gmra.mrb[0].mxu1 %v135_v14 }
 0x1f5   :  { %v224_v0 = vpop.f32.mrb[0].mxu1 }
 0x1f6   :  { %v225_v19 = vadd.f32 %v341_v18, %v224_v0  ;;  %v463_v20 = vpop.f32.mrb[1].mxu1 }
 0x1f8   :  { %vm228_vm2 = vcmp.ge.f32.partialorder %v225_v19, 0.0  ;;  %v229_v21 = vmul.f32 0.1, %v225_v19 }
 0x1fa   :  { %v230_v22 = vsel %vm228_vm2, %v225_v19, %v229_v21 }
 0x1fb   :  { %497 = vmatmul.mubr.f32.vlgmr.msra.gmra.mrb[2].mxu0 %v230_v22 }
 0x2ce   :  { %v319_v24 = vpop.f32.mrb[2].mxu0 }
 0x2cf   :  { %v320_v25 = vadd.f32 %v342_v23, %v319_v24  ;;  %v498_v26 = vpop.f32.mrb[3].mxu0 }
 0x2d1   :  { %323 = vst [vmem:[#allocation7] sm:$0xff] %v320_v25 }
 0x2d2   :  { %634 = shalt.err (!%p631_p6)
}
 0x2d3   :  { %s635_s20 = scalar_lea.hbm %s764_s3, 128 }
 0x2d4   :  { %p636_p7 = scmp.ne.s32.totalorder %s764_s3, %s635_s20  ;;  %p639_p8 = scmp.lt.u32.totalorder %s635_s20, %s764_s3 }
 0x2d6   :  { %p641_p9 = pnand %p639_p8, %p636_p7 }
 0x2d8   :  { %644 = shalt.err (!%p641_p9)
}
 0x2d9   :  { %333 = dma.vmem_to_hbm [thread:$0]  %s331_s16, 128, %s764_s3, [#allocation4]  }
 0x2da   :  { %649 = dma.done.wait [#allocation4], 128  }
 0x2db   :  { %650 = vsyncadd [#allocation4], 4294967168 }
 0x2dc   :  { %337 = vsyncpa [#allocation3], 1 }
 0x2dd   :  { %338 = vsyncpa [#allocation6], 1 }
 0x2de   :  { %339 = vsyncpa [#allocation4], 1 }

</bundles_post_ra>
